<compile_context>
chip_gen: v7x
topology: tpu7x:2x2x1
jax: 0.10.0
libtpu: 0.0.40
codegen_flags: <defaults>
</compile_context>

<pallas_src>
import jax
import jax.numpy as jnp
from jax.experimental import pallas as pl
from jax.experimental.pallas import tpu as pltpu


# ----------------------------------------------------------------------------
# Host-side table construction (pure-JAX port of the PyTorch buffer build).
# ----------------------------------------------------------------------------
def _get_sinusoid_encoding_tables(length, d_hid):
    pos = jnp.arange(1, length + 1, dtype=jnp.float32)          # (L,)
    x_pos = jnp.broadcast_to(pos[:, None], (length, length))    # rows
    y_pos = jnp.broadcast_to(pos[None, :], (length, length))    # cols
    r1 = jnp.sqrt(x_pos ** 2 + y_pos ** 2)
    r = (r1 - jnp.min(r1)) / (jnp.max(r1) - jnp.mean(r1)) + 0.1
    a = jnp.arccos(x_pos / r1)

    j = jnp.arange(d_hid, dtype=jnp.float32)
    # torch: math.pow(10000, 2*hid_j / (d_hid // 3)) — integer division on d_hid.
    # Inherited from the PyTorch source; d_hid < 3 would divide by zero.
    denom = jnp.power(10000.0, 2.0 * j / float(d_hid // 3))     # (C,)
    r_tab = r[None, :, :] / denom[:, None, None]                 # (C, L, L)
    a_tab = a[None, :, :] / denom[:, None, None]

    even = (jnp.arange(d_hid) % 2 == 0)[:, None, None]
    r_tab = jnp.where(even, jnp.sin(r_tab), jnp.cos(r_tab))
    a_tab = jnp.where(even, jnp.sin(a_tab), jnp.cos(a_tab))
    return r_tab.astype(jnp.float32), a_tab.astype(jnp.float32)


def make_position_table(r_table, a_table, H, W):
    """Fold r+a, slice to (H, W), flatten to (C, H*W), keep f32. Cache per shape."""
    C = r_table.shape[0]
    return (r_table[:, :H, :W] + a_table[:, :H, :W]).reshape(C, H * W)


# ----------------------------------------------------------------------------
# Kernels: add in f32, cast on store.
# ----------------------------------------------------------------------------
def _pos_enc_batch_kernel(x_ref, ra_ref, o_ref):
    # x_ref/o_ref: (tb, C, HW) blocks; ra_ref: (C, HW) full table (f32).
    o_ref[...] = (x_ref[...].astype(jnp.float32)
                  + ra_ref[...][None, :, :]).astype(o_ref.dtype)


def _pos_enc_ctile_kernel(x_ref, ra_ref, o_ref):
    # x_ref/o_ref: (tc, HW) blocks of one batch element; ra_ref: (tc, HW) f32.
    o_ref[...] = (x_ref[...].astype(jnp.float32) + ra_ref[...]).astype(o_ref.dtype)


# ----------------------------------------------------------------------------
# Wrapper: out[b, c, h, w] = x[b, c, h, w] + ra[c, h, w] (batch-broadcast add).
# ----------------------------------------------------------------------------
def position_encoding(x, ra_flat, *, block_bytes_budget=6 * 1024 * 1024):
    B, C, H, W = x.shape
    HW = H * W
    assert ra_flat.shape == (C, HW), (ra_flat.shape, (C, HW))
    assert ra_flat.dtype == jnp.float32

    # Lane-dense flatten (last dim full-extent -> always a legal block; a
    # multiple of 128 whenever H*W is, avoiding masked partial stores).
    x2 = x.reshape(B, C, HW)

    itemsize = jnp.dtype(x.dtype).itemsize
    sub = {4: 8, 2: 16, 1: 32}.get(itemsize, 8)   # dtype-aware sublane rounding
    row_bytes = HW * itemsize                      # one C-row of x
    per_b_bytes = C * row_bytes                    # one batch element of x
    ra_bytes = C * HW * 4

    if per_b_bytes <= block_bytes_budget:
        # ----- Small slabs: tile the batch axis with fat blocks. -----
        tb = max(1, min(B, block_bytes_budget // max(per_b_bytes, 1)))
        n_b = pl.cdiv(B, tb)
        grid = (n_b,)
        blk = tb * per_b_bytes
        vmem = 4 * blk + 2 * ra_bytes + (2 << 20)          # x+out dbl-buffered + table
        vmem = int(max(vmem, 8 << 20))                     # never below working set
        semantics = ("parallel",) if n_b >= 2 else ("arbitrary",)

        out2 = pl.pallas_call(
            _pos_enc_batch_kernel,
            out_shape=jax.ShapeDtypeStruct((B, C, HW), x.dtype),
            grid=grid,
            in_specs=[
                pl.BlockSpec((tb, C, HW), lambda i: (i, 0, 0)),
                # Constant block index -> table DMA'd once, reused every step.
                pl.BlockSpec((C, HW), lambda i: (0, 0)),
            ],
            out_specs=pl.BlockSpec((tb, C, HW), lambda i: (i, 0, 0)),
            input_output_aliases={0: 0},
            compiler_params=pltpu.CompilerParams(
                dimension_semantics=semantics,
                vmem_limit_bytes=vmem,
            ),
        )(x2, ra_flat)
    else:
        # ----- Large slabs: tile C; B innermost so the ra block index (only a
        # function of c) is constant across consecutive steps -> fetched once
        # per C tile instead of once per (b, c) step. -----
        tc = (block_bytes_budget // row_bytes) // sub * sub
        tc = min(max(tc, sub), C)
        n_c = pl.cdiv(C, tc)
        grid = (n_c, B)
        blk_x = tc * row_bytes
        blk_ra = tc * HW * 4
        vmem = 4 * blk_x + 2 * blk_ra + (2 << 20)
        vmem = int(max(vmem, 8 << 20))                     # never below working set
        # Leading axis parallel when it has >= 2 tiles (v7x megacore); otherwise
        # let the batch axis carry the parallelism.
        semantics = ("parallel", "arbitrary") if n_c >= 2 else ("arbitrary", "parallel")

        out2 = pl.pallas_call(
            _pos_enc_ctile_kernel,
            out_shape=jax.ShapeDtypeStruct((B, C, HW), x.dtype),
            grid=grid,
            in_specs=[
                pl.BlockSpec((None, tc, HW), lambda c, b: (b, c, 0)),
                pl.BlockSpec((tc, HW), lambda c, b: (c, 0)),
            ],
            out_specs=pl.BlockSpec((None, tc, HW), lambda c, b: (b, c, 0)),
            input_output_aliases={0: 0},
            compiler_params=pltpu.CompilerParams(
                dimension_semantics=semantics,
                vmem_limit_bytes=vmem,
            ),
        )(x2, ra_flat)

    return out2.reshape(B, C, H, W)


# ----------------------------------------------------------------------------
# Module-like wrapper holding the cached buffers (mirrors the PyTorch module).
# ----------------------------------------------------------------------------
class PositionEncoding:
    def __init__(self, d_hid, length=100):
        self.d_hid = d_hid
        self.length = length
        self.r_table, self.a_table = _get_sinusoid_encoding_tables(length, d_hid)
        self._ra_cache = {}

    def __call__(self, x):
        B, C, H, W = x.shape
        key = (H, W)
        if key not in self._ra_cache:
            # One-time per (H, W): slice + fold + flatten the positional table.
            self._ra_cache[key] = jax.block_until_ready(
                make_position_table(self.r_table, self.a_table, H, W))
        return position_encoding(x, self._ra_cache[key])


if __name__ == "__main__":
    # Small shapes consistent with the module: NCHW, C == d_hid, H/W <= length.
    B, d_hid, H, W = 2, 4, 16, 16
    length = 16

    pe = PositionEncoding(d_hid, length=length)

    key = jax.random.PRNGKey(0)
    x = jax.random.normal(key, (B, d_hid, H, W), dtype=jnp.float32)

    # Reference in plain JAX (same semantics as the PyTorch forward).
    ref = x + pe.r_table[None, :, :H, :W] + pe.a_table[None, :, :H, :W]

    out = pe(x)
    out = jax.block_until_ready(out)

    assert out.shape == x.shape
    assert jnp.allclose(out, ref, atol=1e-5, rtol=1e-5), "mismatch vs reference"

    print("KERNEL_OK")
</pallas_src>

<mosaic_0001>
module attributes {stable_mosaic.version = 11 : i64} {
  func.func @_pos_enc_batch_kernel(%arg0: i32, %arg1: memref<2x4x256xf32, #tpu.memory_space<vmem>>, %arg2: memref<4x256xf32, #tpu.memory_space<vmem>>, %arg3: memref<2x4x256xf32, #tpu.memory_space<vmem>>) attributes {dimension_semantics = [#tpu.dimension_semantics<arbitrary>], iteration_bounds = array<i64: 1>, scalar_prefetch = 0 : i64, scratch_operands = 0 : i64, tpu.core_type = #tpu.core_type<tc>, window_params = [{transform_indices = @transform_0, window_bounds = array<i64: 2, 4, 256>}, {pipeline_mode = #tpu.pipeline_mode<synchronous>, transform_indices = @transform_1, window_bounds = array<i64: 4, 256>}, {transform_indices = @transform_2, window_bounds = array<i64: 2, 4, 256>}]} {
    %c0 = arith.constant 0 : index
    %c0_0 = arith.constant 0 : index
    %c0_1 = arith.constant 0 : index
    %0 = vector.load %arg1[%c0, %c0_0, %c0_1] : memref<2x4x256xf32, #tpu.memory_space<vmem>>, vector<2x4x256xf32>
    %c0_2 = arith.constant 0 : index
    %c0_3 = arith.constant 0 : index
    %1 = vector.load %arg2[%c0_2, %c0_3] : memref<4x256xf32, #tpu.memory_space<vmem>>, vector<4x256xf32>
    %2 = vector.shape_cast %1 : vector<4x256xf32> to vector<1x4x256xf32>
    %3 = vector.broadcast %2 : vector<1x4x256xf32> to vector<2x4x256xf32>
    %4 = arith.addf %0, %3 : vector<2x4x256xf32>
    %c0_4 = arith.constant 0 : index
    %c0_5 = arith.constant 0 : index
    %c0_6 = arith.constant 0 : index
    %5 = vector.load %arg3[%c0_4, %c0_5, %c0_6] : memref<2x4x256xf32, #tpu.memory_space<vmem>>, vector<2x4x256xf32>
    tpu.vector_store %arg3[%c0_4, %c0_5, %c0_6], %4 {strides = array<i32>} : memref<2x4x256xf32, #tpu.memory_space<vmem>>, vector<2x4x256xf32>,
    return
  }
  func.func @transform_0(%arg0: i32) -> (i32, i32, i32) {
    %c0_i32 = arith.constant 0 : i32
    %c0_i32_0 = arith.constant 0 : i32
    %c0_i32_1 = arith.constant 0 : i32
    return %arg0, %c0_i32, %c0_i32_0 : i32, i32, i32
  }
  func.func @transform_1(%arg0: i32) -> (i32, i32) {
    %c0_i32 = arith.constant 0 : i32
    %c0_i32_0 = arith.constant 0 : i32
    %c0_i32_1 = arith.constant 0 : i32
    return %c0_i32, %c0_i32_0 : i32, i32
  }
  func.func @transform_2(%arg0: i32) -> (i32, i32, i32) {
    %c0_i32 = arith.constant 0 : i32
    %c0_i32_0 = arith.constant 0 : i32
    %c0_i32_1 = arith.constant 0 : i32
    return %arg0, %c0_i32, %c0_i32_0 : i32, i32, i32
  }
}

</mosaic_0001>

<bundles_post_ra>
// kernel: tpu_custom_call.1
= control target key start
LH: loop header
LB: loop body
LE: loop exit
PB: predicated region body
PF: predicated region fallthrough
CT: control target
= control target key end

     0   :  { %7 = vsyncpa [#allocation3], 0  ;;  %s154_s0 = inlined_call_operand.hbm [shape: f32[2,4,256], index: 0, kind: input, shape index: {}, may-alias: {0,2}]   ;;  %s155_s1 = inlined_call_operand.vmem [shape: f32[4,256], index: 1, kind: input, shape index: {}]   ;;  %s156_s2 = inlined_call_operand.hbm [shape: f32[2,4,256], index: 2, kind: output, shape index: {}, may-alias: {0,2}]  }
   0x1   :  { %8 = vsyncpa [#allocation4], 0  ;;  %s102_s9 = smov [#allocation2]   ;;  %s54_s13 = scalar_lea.hbm %s154_s0, 256 }
   0x2   :  { %s14_s10 = sshll.u32 %s102_s9, 4  ;;  %p55_p0 = scmp.ne.s32.totalorder %s154_s0, %s54_s13  ;;  %s15_s10 = int_to_ptr.vmem [resolvable:$true] %s14_s10 }
   0x3   :  { %p58_p1 = scmp.lt.u32.totalorder %s54_s13, %s154_s0 }
   0x5   :  { %p60_p2 = pnand %p58_p1, %p55_p0 }
   0x7   :  { %63 = shalt.err (!%p60_p2)
}
   0x8   :  { %s64_s18 = scalar_lea.vmem %s15_s10, 256  ;;  %p69_p4 = scmp.lt.s32.totalorder %s15_s10, %s15_s10 }
   0x9   :  { %p65_p3 = scmp.ne.s32.totalorder %s15_s10, %s64_s18  ;;  %p70_p5 = scmp.lt.s32.totalorder %s64_s18, %s64_s18 }
   0xb   :  { %p71_p6 = por %p70_p5, %p69_p4 }
   0xd   :  { %p72_p7 = pnand %p71_p6, %p65_p3 }
   0xf   :  { %75 = shalt.err (!%p72_p7)
}
  0x10   :  { %s103_s19 = smov 128   ;;  %s104_s20 = smov 8  }
  0x11   :  { %20 = dma.hbm_to_vmem [thread:$0]  %s154_s0, 256, %s15_s10, [#allocation3], %s103_s19, %s103_s19, %s104_s20  }
  0x12   :  { %98 = dma.done.wait [#allocation3], 256  }
  0x13   :  { %99 = vsyncadd [#allocation3], 4294967040  ;;  %s105_s23 = smov [#allocation5]   ;;  %v26_v0 = vld [vmem:[#allocation2] sm:$0xff]  ;;  %v27_v2 = vld [vmem:[#allocation2 + $0x8] sm:$0xff] }
  0x14   :  { %s38_s24 = sshll.u32 %s105_s23, 4  ;;  %v28_v1 = vld [vmem:[%s155_s1] sm:$0xff]  ;;  %s39_s24 = int_to_ptr.vmem [resolvable:$true] %s38_s24 }
  0x15   :  { %v29_v3 = vadd.f32 %v28_v1, %v26_v0  ;;  %v30_v4 = vadd.f32 %v28_v1, %v27_v2  ;;  %s76_s27 = scalar_lea.vmem %s39_s24, 256  ;;  %p81_p9 = scmp.lt.s32.totalorder %s39_s24, %s39_s24 }
  0x16   :  { %p77_p8 = scmp.ne.s32.totalorder %s39_s24, %s76_s27  ;;  %p82_p10 = scmp.lt.s32.totalorder %s76_s27, %s76_s27 }
  0x17   :  { %31 = vst [vmem:[#allocation5] sm:$0xff] %v29_v3  ;;  %32 = vst [vmem:[#allocation5 + $0x8] sm:$0xff] %v30_v4 }
  0x18   :  { %p83_p11 = por %p82_p10, %p81_p9 }
  0x1a   :  { %p84_p12 = pnand %p83_p11, %p77_p8 }
  0x1c   :  { %87 = shalt.err (!%p84_p12)
}
  0x1d   :  { %s88_s29 = scalar_lea.hbm %s156_s2, 256 }
  0x1e   :  { %p89_p13 = scmp.ne.s32.totalorder %s156_s2, %s88_s29  ;;  %p92_p0 = scmp.lt.u32.totalorder %s88_s29, %s156_s2 }
  0x20   :  { %p94_p1 = pnand %p92_p0, %p89_p13 }
  0x22   :  { %97 = shalt.err (!%p94_p1)
}
  0x23   :  { %44 = dma.vmem_to_hbm [thread:$0]  %s39_s24, 256, %s156_s2, [#allocation4], %s103_s19, %s103_s19, %s104_s20  }
  0x24   :  { %100 = dma.done.wait [#allocation4], 256  }
  0x25   :  { %101 = vsyncadd [#allocation4], 4294967040 }
  0x26   :  { %48 = vsyncpa [#allocation3], 1 }
  0x27   :  { %49 = vsyncpa [#allocation4], 1 }

</bundles_post_ra>
